<compile_context>
chip_gen: v7x
topology: tpu7x:2x2x1
jax: 0.10.0
libtpu: 0.0.40
codegen_flags: <defaults>
</compile_context>

<pallas_src>
import jax
import jax.numpy as jnp
from jax.experimental import pallas as pl
from jax.experimental.pallas import tpu as pltpu


def _linear_sigmoid_kernel(x_ref, w_ref, b_ref, o_ref):
    # x_ref: [TB, F] (VMEM)   w_ref: [1, F] (VMEM)   b_ref: [1] (SMEM)
    # o_ref: [1, TB] (VMEM)   -- batch along lanes => lane-dense store
    prod = x_ref[...] * w_ref[...]            # VPU: broadcast of [1, F] over rows
    z = jnp.sum(prod, axis=-1)                # XLU lane reduce -> [TB]
    y = jax.nn.sigmoid(z + b_ref[0])          # bias scalar from SMEM, sigmoid on EUP
    o_ref[...] = y.reshape(1, -1).astype(o_ref.dtype)


def _round_up(n, m):
    return ((n + m - 1) // m) * m


def model_forward(x, w, b, *, tb=None):
    """sigmoid(x @ w + b)

    x: [B, F] f32, w: [F, 1] f32, b: [1] f32  ->  [B, 1] f32
    """
    B, F = x.shape
    assert w.shape == (F, 1) and b.shape == (1,)

    # Batch tile: multiple of 8 (sublanes), capped so the double-buffered
    # [TB, F] f32 x tiles stay far below the 32 MiB scoped-VMEM default
    # (and v7x's 64 MiB physical VMEM).
    if tb is None:
        tb = min(1024, _round_up(B, 8))
    tb = _round_up(tb, 8)
    if _round_up(B, tb) > tb:          # more than one tile -> lane-aligned blocks
        tb = _round_up(tb, 128)
    b_pad = _round_up(B, tb)
    num_tiles = b_pad // tb

    if b_pad != B:
        x = jnp.pad(x, ((0, b_pad - B), (0, 0)))

    w_row = w.reshape(1, F)            # pre-transposed weight row for VPU broadcast

    # NOTE: F is small here; for very large F (>~16K) a feature-reduction grid
    # axis with a VMEM accumulator would be added to bound per-step VMEM.
    out = pl.pallas_call(
        _linear_sigmoid_kernel,
        out_shape=jax.ShapeDtypeStruct((1, b_pad), jnp.float32),
        grid_spec=pltpu.PrefetchScalarGridSpec(
            num_scalar_prefetch=0,
            grid=(num_tiles,),
            in_specs=[
                pl.BlockSpec((tb, F), lambda i: (i, 0)),    # x tile (pipelined DMA)
                pl.BlockSpec((1, F), lambda i: (0, 0)),     # weight row (resident)
                pl.BlockSpec(memory_space=pltpu.SMEM),      # bias scalar in SMEM
            ],
            # Lane-dense output: one [1, TB] row per grid step, batch along lanes.
            out_specs=pl.BlockSpec((1, tb), lambda i: (0, i)),
        ),
        compiler_params=pltpu.CompilerParams(
            # Independent batch tiles -> shard across v7x's 2 TensorCores
            # (no-op on v5e/v6e).
            dimension_semantics=("parallel",),
        ),
    )(x, w_row, b)

    # [1, B_pad] -> [B, 1]
    return out.reshape(-1)[:B].reshape(B, 1)


if __name__ == "__main__":
    key = jax.random.PRNGKey(0)
    kx, kw, kb, kx2 = jax.random.split(key, 4)

    B = 8
    n_input_features = 32

    x = jax.random.normal(kx, (B, n_input_features), dtype=jnp.float32)

    # Deterministic parameter init mimicking nn.Linear's uniform(-1/sqrt(F), 1/sqrt(F))
    bound = 1.0 / (n_input_features ** 0.5)
    w = jax.random.uniform(kw, (n_input_features, 1), dtype=jnp.float32,
                           minval=-bound, maxval=bound)
    b = jax.random.uniform(kb, (1,), dtype=jnp.float32,
                           minval=-bound, maxval=bound)

    out = jax.block_until_ready(model_forward(x, w, b))
    ref = jax.nn.sigmoid(x @ w + b)
    assert out.shape == (B, 1)
    assert jnp.allclose(out, ref, atol=1e-5, rtol=1e-5)

    # Multi-tile / padded path (exercises grid > 1, batch padding, parallel axis).
    B2 = 300
    x2 = jax.random.normal(kx2, (B2, n_input_features), dtype=jnp.float32)
    out2 = jax.block_until_ready(model_forward(x2, w, b, tb=128))
    ref2 = jax.nn.sigmoid(x2 @ w + b)
    assert out2.shape == (B2, 1)
    assert jnp.allclose(out2, ref2, atol=1e-5, rtol=1e-5)

    print("KERNEL_OK")
</pallas_src>

<mosaic_0001>
module attributes {stable_mosaic.version = 11 : i64} {
  func.func @_linear_sigmoid_kernel(%arg0: i32, %arg1: memref<8x32xf32, #tpu.memory_space<vmem>>, %arg2: memref<1x32xf32, #tpu.memory_space<vmem>>, %arg3: memref<1xf32, #tpu.memory_space<smem>>, %arg4: memref<1x8xf32, #tpu.memory_space<vmem>>) attributes {dimension_semantics = [#tpu.dimension_semantics<parallel>], iteration_bounds = array<i64: 1>, scalar_prefetch = 0 : i64, scratch_operands = 0 : i64, tpu.core_type = #tpu.core_type<tc>, window_params = [{transform_indices = @transform_0, window_bounds = array<i64: 8, 32>}, {pipeline_mode = #tpu.pipeline_mode<synchronous>, transform_indices = @transform_1, window_bounds = array<i64: 1, 32>}, {transform_indices = @transform_2, window_bounds = array<i64: 1>}, {transform_indices = @transform_3, window_bounds = array<i64: 1, 8>}]} {
    %c0 = arith.constant 0 : index
    %c0_0 = arith.constant 0 : index
    %0 = vector.load %arg1[%c0, %c0_0] : memref<8x32xf32, #tpu.memory_space<vmem>>, vector<8x32xf32>
    %c0_1 = arith.constant 0 : index
    %c0_2 = arith.constant 0 : index
    %1 = vector.load %arg2[%c0_1, %c0_2] : memref<1x32xf32, #tpu.memory_space<vmem>>, vector<1x32xf32>
    %2 = vector.broadcast %1 : vector<1x32xf32> to vector<8x32xf32>
    %3 = arith.mulf %0, %2 : vector<8x32xf32>
    %cst = arith.constant dense<0.000000e+00> : vector<8xf32>
    %4 = vector.multi_reduction <add>, %3, %cst [1] : vector<8x32xf32> to vector<8xf32>
    %c0_3 = arith.constant 0 : index
    %5 = memref.load %arg3[%c0_3] : memref<1xf32, #tpu.memory_space<smem>>
    %6 = vector.broadcast %5 : f32 to vector<8xf32>
    %7 = arith.addf %4, %6 : vector<8xf32>
    %8 = arith.negf %7 : vector<8xf32>
    %9 = math.exp %8 : vector<8xf32>
    %cst_4 = arith.constant 1.000000e+00 : f32
    %10 = vector.broadcast %cst_4 : f32 to vector<8xf32>
    %11 = arith.addf %10, %9 : vector<8xf32>
    %12 = arith.divf %10, %11 : vector<8xf32>
    %13 = vector.shape_cast %12 : vector<8xf32> to vector<1x8xf32>
    %c0_5 = arith.constant 0 : index
    %c0_6 = arith.constant 0 : index
    %14 = vector.load %arg4[%c0_5, %c0_6] : memref<1x8xf32, #tpu.memory_space<vmem>>, vector<1x8xf32>
    tpu.vector_store %arg4[%c0_5, %c0_6], %13 {strides = array<i32>} : memref<1x8xf32, #tpu.memory_space<vmem>>, vector<1x8xf32>,
    return
  }
  func.func @transform_0(%arg0: i32) -> (i32, i32) {
    %c0_i32 = arith.constant 0 : i32
    %c0_i32_0 = arith.constant 0 : i32
    return %arg0, %c0_i32 : i32, i32
  }
  func.func @transform_1(%arg0: i32) -> (i32, i32) {
    %c0_i32 = arith.constant 0 : i32
    %c0_i32_0 = arith.constant 0 : i32
    %c0_i32_1 = arith.constant 0 : i32
    return %c0_i32, %c0_i32_0 : i32, i32
  }
  func.func @transform_2(%arg0: i32) -> i32 {
    %c0_i32 = arith.constant 0 : i32
    %c0_i32_0 = arith.constant 0 : i32
    return %c0_i32 : i32
  }
  func.func @transform_3(%arg0: i32) -> (i32, i32) {
    %c0_i32 = arith.constant 0 : i32
    %c0_i32_0 = arith.constant 0 : i32
    return %c0_i32, %arg0 : i32, i32
  }
}

</mosaic_0001>

<bundles_post_ra>
// kernel: tpu_custom_call.1
= control target key start
LH: loop header
LB: loop body
LE: loop exit
PB: predicated region body
PF: predicated region fallthrough
CT: control target
= control target key end

     0   :  { %9 = vsyncpa [#allocation4], 0  ;;  %s183_s0 = inlined_call_operand.hbm [shape: f32[8,32], index: 0, kind: input, shape index: {}]   ;;  %s184_s1 = inlined_call_operand.vmem [shape: f32[1,32], index: 1, kind: input, shape index: {}]   ;;  %s185_s2 = inlined_call_operand.<no memory space> [shape: f32[1], index: 2, kind: input, shape index: {}]   ;;  %s186_s3 = inlined_call_operand.hbm [shape: f32[1,8], index: 3, kind: output, shape index: {}]  }
   0x1   :  { %10 = vsyncpa [#allocation5], 0  ;;  %s131_s12 = smov [#allocation3]   ;;  %s83_s16 = scalar_lea.hbm %s183_s0, 128 }
   0x2   :  { %s17_s13 = sshll.u32 %s131_s12, 4  ;;  %p84_p0 = scmp.ne.s32.totalorder %s183_s0, %s83_s16  ;;  %s18_s13 = int_to_ptr.vmem [resolvable:$true] %s17_s13 }
   0x3   :  { %p87_p1 = scmp.lt.u32.totalorder %s83_s16, %s183_s0 }
   0x5   :  { %p89_p2 = pnand %p87_p1, %p84_p0 }
   0x7   :  { %92 = shalt.err (!%p89_p2)
}
   0x8   :  { %s93_s21 = scalar_lea.vmem %s18_s13, 128  ;;  %p98_p4 = scmp.lt.s32.totalorder %s18_s13, %s18_s13 }
   0x9   :  { %p94_p3 = scmp.ne.s32.totalorder %s18_s13, %s93_s21  ;;  %p99_p5 = scmp.lt.s32.totalorder %s93_s21, %s93_s21 }
   0xb   :  { %p100_p6 = por %p99_p5, %p98_p4 }
   0xd   :  { %p101_p7 = pnand %p100_p6, %p94_p3 }
   0xf   :  { %104 = shalt.err (!%p101_p7)
}
  0x10   :  { %20 = dma.hbm_to_vmem [thread:$0]  %s183_s0, 128, %s18_s13, [#allocation4]  }
  0x11   :  { %127 = dma.done.wait [#allocation4], 128  }
  0x12   :  { %128 = vsyncadd [#allocation4], 4294967168  ;;  %v28_v0 = vld [vmem:[#allocation3] sm:$0xff]  ;;  %vm37_vm0 = vcmask 261120   ;;  %v42_v4 = vstv %s185_s2  ;;  %v51_v10 = vlaneseq  ;;  %s132_s0 = smov [#allocation6]   ;;  %vm58_vm1 = vcmask 57344  }
  0x13   :  { %v75_v1 = vld [vmem:[%s184_s1] ss:$0 sm:$0xff]  ;;  %s66_s1 = sshll.u32 %s132_s0, 4  ;;  %s67_s1 = int_to_ptr.vmem [resolvable:$true] %s66_s1 }
  0x14   :  { %v36_v2 = vmul.f32 %v75_v1, %v28_v0  ;;  %v52_v11 = vand.u32 127, %v51_v10  ;;  %v54_v12 = vshrl.u32 %v51_v10, 7  ;;  %s105_s28 = scalar_lea.vmem %s67_s1, 16  ;;  %s109_s2 = scalar_lea.vmem %s67_s1, 32 }
  0x15   :  { %p106_p8 = scmp.ne.s32.totalorder %s67_s1, %s105_s28  ;;  %p110_p9 = scmp.lt.s32.totalorder %s67_s1, %s67_s1 }
  0x16   :  { %v38_v3 = vsel %vm37_vm0, %v36_v2, 0.0  ;;  %v55_v13 = vsub.s32 %v52_v11, %v54_v12  ;;  %p111_p10 = scmp.lt.s32.totalorder %s109_s2, %s105_s28 }
  0x17   :  { %39 = vadd.xlane.f32.xlu0 %v38_v3 }
  0x18   :  { %p112_p11 = por %p111_p10, %p110_p9 }
  0x1a   :  { %p113_p12 = pnand %p112_p11, %p106_p8 }
  0xa4   :  { %v40_v5 = vpop.xlane.xlu0 %39 }
  0xa5   :  { %v43_v6 = vadd.f32 %v42_v4, %v40_v5 }
  0xa7   :  { %v76_v7 = vmul.f32 -1.442695, %v43_v6 }
  0xa9   :  { %79 = vpow2.f32 %v76_v7 }
  0xb3   :  { %v80_v8 = vpop.eup %79 }
  0xb4   :  { %v47_v9 = vadd.f32 1.0, %v80_v8 }
  0xb6   :  { %81 = vrcp.f32 %v47_v9 }
  0xc0   :  { %v82_v14 = vpop.eup %81 }
  0xc1   :  { %v56_v15 = vrot.slane %v82_v14, %v55_v13 }
  0xc3   :  { %59 = vst.msk [vmem:[#allocation6] sm:$0x1] %vm58_vm1, %v56_v15 }
  0xc4   :  { %116 = shalt.err (!%p113_p12)
}
  0xc5   :  { %s117_s4 = scalar_lea.hbm %s186_s3, 16 }
  0xc6   :  { %p118_p13 = scmp.ne.s32.totalorder %s186_s3, %s117_s4  ;;  %p121_p0 = scmp.lt.u32.totalorder %s117_s4, %s186_s3 }
  0xc8   :  { %p123_p1 = pnand %p121_p0, %p118_p13 }
  0xca   :  { %126 = shalt.err (!%p123_p1)
}
  0xcb   :  { %69 = dma.vmem_to_hbm [thread:$0]  %s67_s1, 16, %s186_s3, [#allocation5]  }
  0xcc   :  { %129 = dma.done.wait [#allocation5], 16  }
  0xcd   :  { %130 = vsyncadd [#allocation5], 4294967280 }
  0xce   :  { %73 = vsyncpa [#allocation4], 1 }
  0xcf   :  { %74 = vsyncpa [#allocation5], 1 }

</bundles_post_ra>
